<compile_context>
chip_gen: v7x
topology: tpu7x:2x2x1
jax: 0.10.0
libtpu: 0.0.40
codegen_flags: <defaults>
</compile_context>

<pallas_src>
import numpy as np
import jax
import jax.numpy as jnp
from jax import lax
from jax.experimental import pallas as pl
from jax.experimental.pallas import tpu as pltpu


SLAB_W = 128          # padded input-slab width (lanes): emb(48)|value(10)|wide(12)|pad
HID_W = 128           # padded hidden width (lanes)
OUT_W = 8             # output array width (lanes 0:2 meaningful)
WIDE_LO = 64          # lanes 64:66 carry the wide branch through layers 1-4
W_ROWS = 5 * HID_W    # 640 rows of packed weights (layers 1-5)
TB_MAX = 512          # batch-tile cap
W_DTYPE = jnp.bfloat16


def _round_up(x, m):
    return (x + m - 1) // m * m


def _cdiv(a, b):
    return -(-a // b)


# ----------------------------- Pallas kernel --------------------------------
def wide_deep_kernel(x_ref, w_ref, b_ref, o_ref):
    """One batch tile of the fused Wide&Deep forward.

    x_ref : (TB, 128) bf16   [emb | value | wide | zero pad]
    w_ref : (640, 128) bf16  five stacked zero-padded weight blocks (VMEM-resident)
    b_ref : (8, 128) f32     rows 0-4: layer biases; rows 5/6/7: wo0/wo1/bo broadcast
    o_ref : (TB, 8) f32      lanes 0:2 hold the result
    """
    x = x_ref[...]
    tb = x.shape[0]

    def layer(h, row0, brow):
        w = w_ref[row0:row0 + HID_W, :]               # static, tile-aligned slice
        acc = jnp.dot(h, w, preferred_element_type=jnp.float32)
        return acc + b_ref[brow:brow + 1, :]

    # Layer 1 (fused): deep_layer_1 on lanes 0:64 (ReLU), wide_layer on lanes
    # 64:66 (sigmoid).  Lanes >= 66 get sigmoid(0)=0.5 and hit zero rows later.
    pre1 = layer(x, 0, 0)
    lane = lax.broadcasted_iota(jnp.int32, (tb, HID_W), 1)
    h = jnp.where(lane < WIDE_LO, jnp.maximum(pre1, 0.0), jax.nn.sigmoid(pre1))
    h = h.astype(x.dtype)

    # Layers 2-5: deep path (ReLU).  Sigmoided wide values live in (0,1), so the
    # identity pass-through lanes survive the ReLUs unchanged.
    h = jnp.maximum(layer(h, 128, 1), 0.0).astype(x.dtype)   # deep_layer_2 (64)
    h = jnp.maximum(layer(h, 256, 2), 0.0).astype(x.dtype)   # deep_layer_3 (32)
    h = jnp.maximum(layer(h, 384, 3), 0.0).astype(x.dtype)   # deep_layer_4 (16)
    h = jnp.maximum(layer(h, 512, 4), 0.0)                    # deep_layer_5: cat5->0:2, wide->2:4 (f32)

    # Shared head as a VPU/EUP epilogue (no matmul):
    #   out[:, j] = sigmoid(wo0 * cat5[:, j] + wo1 * wide[:, j] + bo),  j in {0,1}
    h_r = pltpu.roll(h, shift=HID_W - 2, axis=1)      # lane i <- lane (i+2) mod 128
    o_full = jax.nn.sigmoid(b_ref[5:6, :] * h + b_ref[6:7, :] * h_r + b_ref[7:8, :])
    o8 = o_full[:, 0:OUT_W]
    lane8 = lax.broadcasted_iota(jnp.int32, (tb, OUT_W), 1)
    o_ref[...] = jnp.where(lane8 < 2, o8, 0.0)


# --------------------------- parameter packing --------------------------------
def pack_params(p, *, wide_num):
    """Pack all Linear layers + wide branch + head into two lane-dense buffers."""
    f32 = jnp.float32
    w1 = p["w1"].astype(f32)              # (deep_in, 64), stored (in, out)
    deep_in = w1.shape[0]

    # ---- layer 1 + wide layer, (128, 128) ----
    w1_big = jnp.zeros((HID_W, HID_W), f32)
    w1_big = w1_big.at[0:deep_in, 0:64].set(w1)
    w1_big = w1_big.at[deep_in:deep_in + wide_num, WIDE_LO:WIDE_LO + 2].set(
        p["ww"].astype(f32))

    # ---- hidden layers 2..5, each (128, 128) with identity wide pass-through ----
    def hid_block(w, out_w, pass_cols):
        wb = jnp.zeros((HID_W, HID_W), f32)
        wb = wb.at[:w.shape[0], :out_w].set(w.astype(f32))
        wb = wb.at[WIDE_LO, pass_cols[0]].set(1.0)
        wb = wb.at[WIDE_LO + 1, pass_cols[1]].set(1.0)
        return wb

    w2_big = hid_block(p["w2"], 64, (WIDE_LO, WIDE_LO + 1))
    w3_big = hid_block(p["w3"], 32, (WIDE_LO, WIDE_LO + 1))
    w4_big = hid_block(p["w4"], 16, (WIDE_LO, WIDE_LO + 1))
    w5_big = hid_block(p["w5"], 2, (2, 3))     # cat5 -> lanes 0:2, wide -> lanes 2:4

    W_all = jnp.concatenate([w1_big, w2_big, w3_big, w4_big, w5_big],
                            axis=0).astype(W_DTYPE)
    assert W_all.shape == (W_ROWS, HID_W)

    # ---- biases + head scalars (f32, tiny, stays f32 for the epilogue) ----
    b1 = jnp.zeros((HID_W,), f32).at[0:64].set(p["b1"].reshape(-1))
    b1 = b1.at[WIDE_LO:WIDE_LO + 2].set(p["wb"].reshape(-1))
    b2 = jnp.zeros((HID_W,), f32).at[0:64].set(p["b2"].reshape(-1))
    b3 = jnp.zeros((HID_W,), f32).at[0:32].set(p["b3"].reshape(-1))
    b4 = jnp.zeros((HID_W,), f32).at[0:16].set(p["b4"].reshape(-1))
    b5 = jnp.zeros((HID_W,), f32).at[0:2].set(p["b5"].reshape(-1))

    wo = p["wo"].reshape(-1).astype(f32)
    bo = p["bo"].reshape(-1).astype(f32)
    r5 = jnp.full((HID_W,), wo[0], f32)        # wo0 broadcast
    r6 = jnp.full((HID_W,), wo[1], f32)        # wo1 broadcast
    r7 = jnp.full((HID_W,), bo[0], f32)        # bo  broadcast

    B_all = jnp.stack([b1, b2, b3, b4, b5, r5, r6, r7], axis=0)   # (8, 128)
    return W_all, B_all


# ------------------------------ wrapper --------------------------------------
def wide_deep_forward(value_batch, embedd_batch, wide_batch, emb_table, W_all, B_all):
    B = value_batch.shape[0]

    # Embedding gather in the wrapper (XLA), then one fused concat/cast/pad into
    # the 128-lane input slab.  jnp.take clamps out-of-range indices, matching
    # the pure-JAX reference (PyTorch would raise on invalid indices).
    emb = jnp.take(emb_table, embedd_batch, axis=0).reshape(B, -1)
    x = jnp.concatenate(
        [emb, value_batch.astype(jnp.float32), wide_batch.astype(jnp.float32)],
        axis=1).astype(W_DTYPE)
    used = x.shape[1]

    # Tile selection: biggest tile up to TB_MAX, minimal padding; even tile
    # count for B > 256 so the "parallel" batch axis uses both v7x TensorCores.
    if B <= 256:
        n_tiles = 1
    else:
        n_tiles = _cdiv(B, TB_MAX)
        n_tiles += n_tiles % 2
    tb = _round_up(_cdiv(B, n_tiles), 16)       # 16-row multiple (bf16 sublanes)
    b_pad = tb * n_tiles

    x = jnp.pad(x, ((0, b_pad - B), (0, SLAB_W - used)))

    out = pl.pallas_call(
        wide_deep_kernel,
        out_shape=jax.ShapeDtypeStruct((b_pad, OUT_W), jnp.float32),
        grid=(n_tiles,),
        in_specs=[
            pl.BlockSpec((tb, SLAB_W), lambda i: (i, 0)),       # activation tile
            pl.BlockSpec((W_ROWS, HID_W), lambda i: (0, 0)),    # weights: resident
            pl.BlockSpec((8, HID_W), lambda i: (0, 0)),         # biases: resident
        ],
        out_specs=pl.BlockSpec((tb, OUT_W), lambda i: (i, 0)),
        compiler_params=pltpu.CompilerParams(
            dimension_semantics=("parallel",)),
    )(x, W_all, B_all)

    return out[:B, 0:2]


# --------------------------- parameter setup ---------------------------------
def make_params(key, bag_size, embedding_size, num_embed, num_val, wide_num):
    """PyTorch-shaped params; Linear W stored pre-transposed as (in, out)."""
    def linear_init(k, fan_in, fan_out):
        kw, kb = jax.random.split(k)
        bound = 1.0 / np.sqrt(fan_in)
        w = jax.random.uniform(kw, (fan_in, fan_out), jnp.float32, -bound, bound)
        b = jax.random.uniform(kb, (1, fan_out), jnp.float32, -bound, bound)
        return w, b

    keys = jax.random.split(key, 9)
    deep_in = embedding_size * num_embed + num_val

    params = {}
    params["emb_table"] = jax.random.normal(keys[0], (bag_size, embedding_size), jnp.float32)
    params["w1"], params["b1"] = linear_init(keys[1], deep_in, 64)
    params["w2"], params["b2"] = linear_init(keys[2], 64, 64)
    params["w3"], params["b3"] = linear_init(keys[3], 64, 32)
    params["w4"], params["b4"] = linear_init(keys[4], 32, 16)
    params["w5"], params["b5"] = linear_init(keys[5], 16, 2)
    params["ww"], params["wb"] = linear_init(keys[6], wide_num, 2)
    # output_layer_1: Linear(2, 1) -> stored as flat (2,) weights + (1,) bias.
    wo, bo = linear_init(keys[7], 2, 1)
    params["wo"] = wo.reshape(2)
    params["bo"] = bo.reshape(1)
    return params


# --------------------------- pure-JAX reference -------------------------------
def ref_forward(value_batch, embedd_batch, wide_batch, p):
    B = value_batch.shape[0]
    emb = jnp.take(p["emb_table"], embedd_batch, axis=0).reshape(B, -1)
    x = jnp.concatenate([emb, value_batch], axis=1)
    h = jax.nn.relu(x @ p["w1"] + p["b1"])
    h = jax.nn.relu(h @ p["w2"] + p["b2"])
    h = jax.nn.relu(h @ p["w3"] + p["b3"])
    h = jax.nn.relu(h @ p["w4"] + p["b4"])
    cat5 = jax.nn.relu(h @ p["w5"] + p["b5"])
    wide = jax.nn.sigmoid(wide_batch @ p["ww"] + p["wb"])
    o1 = jax.nn.sigmoid(cat5[:, 0:1] * p["wo"][0] + wide[:, 0:1] * p["wo"][1] + p["bo"][0])
    o2 = jax.nn.sigmoid(cat5[:, 1:2] * p["wo"][0] + wide[:, 1:2] * p["wo"][1] + p["bo"][0])
    return jnp.concatenate([o1, o2], axis=1)


# ---------------------------------- main --------------------------------------
if __name__ == "__main__":
    B = 8
    EMBEDDING_SIZE = 8      # opt.EmbeddingSize
    NUM_EMBED = 6           # kwargs['num_embed']
    NUM_VAL = 10            # kwargs['num_val']
    BAG_SIZE = 20           # kwargs['bag_size']
    WIDE_NUM = 12           # kwargs['wide_num']

    key = jax.random.PRNGKey(0)
    k_params, k_val, k_idx, k_wide = jax.random.split(key, 4)

    params = make_params(k_params, BAG_SIZE, EMBEDDING_SIZE, NUM_EMBED, NUM_VAL, WIDE_NUM)
    W_all, B_all = pack_params(params, wide_num=WIDE_NUM)
    W_all = jax.block_until_ready(W_all)
    B_all = jax.block_until_ready(B_all)

    value_batch = jax.random.normal(k_val, (B, NUM_VAL), jnp.float32)
    embedd_batch = jax.random.randint(k_idx, (B, NUM_EMBED), 0, BAG_SIZE, jnp.int32)
    wide_batch = jax.random.normal(k_wide, (B, WIDE_NUM), jnp.float32)

    fwd = jax.jit(wide_deep_forward)
    out = fwd(value_batch, embedd_batch, wide_batch, params["emb_table"], W_all, B_all)
    out = jax.block_until_ready(out)

    ref = jax.block_until_ready(ref_forward(value_batch, embedd_batch, wide_batch, params))
    # bf16 matmuls vs f32 reference -> relaxed tolerance (outputs are sigmoids in (0,1)).
    np.testing.assert_allclose(np.asarray(out), np.asarray(ref), rtol=3e-2, atol=3e-2)

    assert out.shape == (B, 2) and out.dtype == jnp.float32
    print("KERNEL_OK")
</pallas_src>

<mosaic_0001>
module attributes {stable_mosaic.version = 11 : i64} {
  func.func @wide_deep_kernel(%arg0: i32, %arg1: memref<16x128xbf16, #tpu.memory_space<vmem>>, %arg2: memref<640x128xbf16, #tpu.memory_space<vmem>>, %arg3: memref<8x128xf32, #tpu.memory_space<vmem>>, %arg4: memref<16x8xf32, #tpu.memory_space<vmem>>) attributes {dimension_semantics = [#tpu.dimension_semantics<parallel>], iteration_bounds = array<i64: 1>, scalar_prefetch = 0 : i64, scratch_operands = 0 : i64, tpu.core_type = #tpu.core_type<tc>, window_params = [{transform_indices = @transform_0, window_bounds = array<i64: 16, 128>}, {pipeline_mode = #tpu.pipeline_mode<synchronous>, transform_indices = @transform_1, window_bounds = array<i64: 640, 128>}, {pipeline_mode = #tpu.pipeline_mode<synchronous>, transform_indices = @transform_2, window_bounds = array<i64: 8, 128>}, {transform_indices = @transform_3, window_bounds = array<i64: 16, 8>}]} {
    %c0 = arith.constant 0 : index
    %c0_0 = arith.constant 0 : index
    %0 = vector.load %arg1[%c0, %c0_0] : memref<16x128xbf16, #tpu.memory_space<vmem>>, vector<16x128xbf16>
    %c0_1 = arith.constant 0 : index
    %c0_2 = arith.constant 0 : index
    %1 = vector.load %arg2[%c0_1, %c0_2] : memref<640x128xbf16, #tpu.memory_space<vmem>>, vector<128x128xbf16>
    %cst = arith.constant dense<0.000000e+00> : vector<16x128xf32>
    %2 = tpu.matmul %0, %1, %cst {dimension_numbers = #tpu.dot_dimension_numbers<[1], [0], [0], [1], [0, 0, 1, 1], [], []>} : vector<16x128xbf16>, vector<128x128xbf16>, vector<16x128xf32> -> vector<16x128xf32>
    %c0_3 = arith.constant 0 : index
    %c0_4 = arith.constant 0 : index
    %3 = vector.load %arg3[%c0_3, %c0_4] : memref<8x128xf32, #tpu.memory_space<vmem>>, vector<1x128xf32>
    %4 = vector.broadcast %3 : vector<1x128xf32> to vector<16x128xf32>
    %5 = arith.addf %2, %4 : vector<16x128xf32>
    %6 = tpu.iota {dimensions = array<i32: 1>} : vector<16x128xi32>
    %c64_i32 = arith.constant 64 : i32
    %7 = vector.broadcast %c64_i32 : i32 to vector<16x128xi32>
    %8 = arith.cmpi slt, %6, %7 : vector<16x128xi32>
    %cst_5 = arith.constant 0.000000e+00 : f32
    %9 = vector.broadcast %cst_5 : f32 to vector<16x128xf32>
    %10 = arith.maximumf %5, %9 : vector<16x128xf32>
    %11 = arith.negf %5 : vector<16x128xf32>
    %12 = math.exp %11 : vector<16x128xf32>
    %cst_6 = arith.constant 1.000000e+00 : f32
    %13 = vector.broadcast %cst_6 : f32 to vector<16x128xf32>
    %14 = arith.addf %13, %12 : vector<16x128xf32>
    %15 = arith.divf %13, %14 : vector<16x128xf32>
    %16 = arith.select %8, %10, %15 : vector<16x128xi1>, vector<16x128xf32>
    %17 = arith.truncf %16 : vector<16x128xf32> to vector<16x128xbf16>
    %c128 = arith.constant 128 : index
    %c0_7 = arith.constant 0 : index
    %18 = vector.load %arg2[%c128, %c0_7] : memref<640x128xbf16, #tpu.memory_space<vmem>>, vector<128x128xbf16>
    %cst_8 = arith.constant dense<0.000000e+00> : vector<16x128xf32>
    %19 = tpu.matmul %17, %18, %cst_8 {dimension_numbers = #tpu.dot_dimension_numbers<[1], [0], [0], [1], [0, 0, 1, 1], [], []>} : vector<16x128xbf16>, vector<128x128xbf16>, vector<16x128xf32> -> vector<16x128xf32>
    %c1 = arith.constant 1 : index
    %c0_9 = arith.constant 0 : index
    %20 = vector.load %arg3[%c1, %c0_9] : memref<8x128xf32, #tpu.memory_space<vmem>>, vector<1x128xf32>
    %21 = vector.broadcast %20 : vector<1x128xf32> to vector<16x128xf32>
    %22 = arith.addf %19, %21 : vector<16x128xf32>
    %cst_10 = arith.constant 0.000000e+00 : f32
    %23 = vector.broadcast %cst_10 : f32 to vector<16x128xf32>
    %24 = arith.maximumf %22, %23 : vector<16x128xf32>
    %25 = arith.truncf %24 : vector<16x128xf32> to vector<16x128xbf16>
    %c256 = arith.constant 256 : index
    %c0_11 = arith.constant 0 : index
    %26 = vector.load %arg2[%c256, %c0_11] : memref<640x128xbf16, #tpu.memory_space<vmem>>, vector<128x128xbf16>
    %cst_12 = arith.constant dense<0.000000e+00> : vector<16x128xf32>
    %27 = tpu.matmul %25, %26, %cst_12 {dimension_numbers = #tpu.dot_dimension_numbers<[1], [0], [0], [1], [0, 0, 1, 1], [], []>} : vector<16x128xbf16>, vector<128x128xbf16>, vector<16x128xf32> -> vector<16x128xf32>
    %c2 = arith.constant 2 : index
    %c0_13 = arith.constant 0 : index
    %28 = vector.load %arg3[%c2, %c0_13] : memref<8x128xf32, #tpu.memory_space<vmem>>, vector<1x128xf32>
    %29 = vector.broadcast %28 : vector<1x128xf32> to vector<16x128xf32>
    %30 = arith.addf %27, %29 : vector<16x128xf32>
    %cst_14 = arith.constant 0.000000e+00 : f32
    %31 = vector.broadcast %cst_14 : f32 to vector<16x128xf32>
    %32 = arith.maximumf %30, %31 : vector<16x128xf32>
    %33 = arith.truncf %32 : vector<16x128xf32> to vector<16x128xbf16>
    %c384 = arith.constant 384 : index
    %c0_15 = arith.constant 0 : index
    %34 = vector.load %arg2[%c384, %c0_15] : memref<640x128xbf16, #tpu.memory_space<vmem>>, vector<128x128xbf16>
    %cst_16 = arith.constant dense<0.000000e+00> : vector<16x128xf32>
    %35 = tpu.matmul %33, %34, %cst_16 {dimension_numbers = #tpu.dot_dimension_numbers<[1], [0], [0], [1], [0, 0, 1, 1], [], []>} : vector<16x128xbf16>, vector<128x128xbf16>, vector<16x128xf32> -> vector<16x128xf32>
    %c3 = arith.constant 3 : index
    %c0_17 = arith.constant 0 : index
    %36 = vector.load %arg3[%c3, %c0_17] : memref<8x128xf32, #tpu.memory_space<vmem>>, vector<1x128xf32>
    %37 = vector.broadcast %36 : vector<1x128xf32> to vector<16x128xf32>
    %38 = arith.addf %35, %37 : vector<16x128xf32>
    %cst_18 = arith.constant 0.000000e+00 : f32
    %39 = vector.broadcast %cst_18 : f32 to vector<16x128xf32>
    %40 = arith.maximumf %38, %39 : vector<16x128xf32>
    %41 = arith.truncf %40 : vector<16x128xf32> to vector<16x128xbf16>
    %c512 = arith.constant 512 : index
    %c0_19 = arith.constant 0 : index
    %42 = vector.load %arg2[%c512, %c0_19] : memref<640x128xbf16, #tpu.memory_space<vmem>>, vector<128x128xbf16>
    %cst_20 = arith.constant dense<0.000000e+00> : vector<16x128xf32>
    %43 = tpu.matmul %41, %42, %cst_20 {dimension_numbers = #tpu.dot_dimension_numbers<[1], [0], [0], [1], [0, 0, 1, 1], [], []>} : vector<16x128xbf16>, vector<128x128xbf16>, vector<16x128xf32> -> vector<16x128xf32>
    %c4 = arith.constant 4 : index
    %c0_21 = arith.constant 0 : index
    %44 = vector.load %arg3[%c4, %c0_21] : memref<8x128xf32, #tpu.memory_space<vmem>>, vector<1x128xf32>
    %45 = vector.broadcast %44 : vector<1x128xf32> to vector<16x128xf32>
    %46 = arith.addf %43, %45 : vector<16x128xf32>
    %cst_22 = arith.constant 0.000000e+00 : f32
    %47 = vector.broadcast %cst_22 : f32 to vector<16x128xf32>
    %48 = arith.maximumf %46, %47 : vector<16x128xf32>
    %c126_i32 = arith.constant 126 : i32
    %49 = tpu.dynamic_rotate %48 by %c126_i32 dim 1 : vector<16x128xf32>, i32 -> vector<16x128xf32>
    %c5 = arith.constant 5 : index
    %c0_23 = arith.constant 0 : index
    %50 = vector.load %arg3[%c5, %c0_23] : memref<8x128xf32, #tpu.memory_space<vmem>>, vector<1x128xf32>
    %51 = vector.broadcast %50 : vector<1x128xf32> to vector<16x128xf32>
    %52 = arith.mulf %51, %48 : vector<16x128xf32>
    %c6 = arith.constant 6 : index
    %c0_24 = arith.constant 0 : index
    %53 = vector.load %arg3[%c6, %c0_24] : memref<8x128xf32, #tpu.memory_space<vmem>>, vector<1x128xf32>
    %54 = vector.broadcast %53 : vector<1x128xf32> to vector<16x128xf32>
    %55 = arith.mulf %54, %49 : vector<16x128xf32>
    %56 = arith.addf %52, %55 : vector<16x128xf32>
    %c7 = arith.constant 7 : index
    %c0_25 = arith.constant 0 : index
    %57 = vector.load %arg3[%c7, %c0_25] : memref<8x128xf32, #tpu.memory_space<vmem>>, vector<1x128xf32>
    %58 = vector.broadcast %57 : vector<1x128xf32> to vector<16x128xf32>
    %59 = arith.addf %56, %58 : vector<16x128xf32>
    %60 = arith.negf %59 : vector<16x128xf32>
    %61 = math.exp %60 : vector<16x128xf32>
    %cst_26 = arith.constant 1.000000e+00 : f32
    %62 = vector.broadcast %cst_26 : f32 to vector<16x128xf32>
    %63 = arith.addf %62, %61 : vector<16x128xf32>
    %64 = arith.divf %62, %63 : vector<16x128xf32>
    %65 = vector.extract_strided_slice %64 {offsets = [0, 0], sizes = [16, 8], strides = [1, 1]} : vector<16x128xf32> to vector<16x8xf32>
    %66 = tpu.iota {dimensions = array<i32: 1>} : vector<16x8xi32>
    %c2_i32 = arith.constant 2 : i32
    %67 = vector.broadcast %c2_i32 : i32 to vector<16x8xi32>
    %68 = arith.cmpi slt, %66, %67 : vector<16x8xi32>
    %cst_27 = arith.constant 0.000000e+00 : f32
    %69 = vector.broadcast %cst_27 : f32 to vector<16x8xf32>
    %70 = arith.select %68, %65, %69 : vector<16x8xi1>, vector<16x8xf32>
    %c0_28 = arith.constant 0 : index
    %c0_29 = arith.constant 0 : index
    %71 = vector.load %arg4[%c0_28, %c0_29] : memref<16x8xf32, #tpu.memory_space<vmem>>, vector<16x8xf32>
    tpu.vector_store %arg4[%c0_28, %c0_29], %70 {strides = array<i32>} : memref<16x8xf32, #tpu.memory_space<vmem>>, vector<16x8xf32>,
    return
  }
  func.func @transform_0(%arg0: i32) -> (i32, i32) {
    %c0_i32 = arith.constant 0 : i32
    %c0_i32_0 = arith.constant 0 : i32
    return %arg0, %c0_i32 : i32, i32
  }
  func.func @transform_1(%arg0: i32) -> (i32, i32) {
    %c0_i32 = arith.constant 0 : i32
    %c0_i32_0 = arith.constant 0 : i32
    %c0_i32_1 = arith.constant 0 : i32
    return %c0_i32, %c0_i32_0 : i32, i32
  }
  func.func @transform_2(%arg0: i32) -> (i32, i32) {
    %c0_i32 = arith.constant 0 : i32
    %c0_i32_0 = arith.constant 0 : i32
    %c0_i32_1 = arith.constant 0 : i32
    return %c0_i32, %c0_i32_0 : i32, i32
  }
  func.func @transform_3(%arg0: i32) -> (i32, i32) {
    %c0_i32 = arith.constant 0 : i32
    %c0_i32_0 = arith.constant 0 : i32
    return %arg0, %c0_i32 : i32, i32
  }
}

</mosaic_0001>

<bundles_post_ra>
// kernel: wide_deep_forward.1
= control target key start
LH: loop header
LB: loop body
LE: loop exit
PB: predicated region body
PF: predicated region fallthrough
CT: control target
= control target key end

     0   :  { %v911_v0 = vmov 0.0   ;;  %vm912_vm0 = vmmov 0   ;;  %v133_v37 = vlaneseq  ;;  %vm646_vm3 = vcmask 64512   ;;  %s1141_s1 = inlined_call_operand.vmem [shape: bf16[640,128], index: 1, kind: input, shape index: {}]   ;;  %s1142_s0 = inlined_call_operand.vmem [shape: bf16[16,128], index: 0, kind: input, shape index: {}]   ;;  %s1143_s2 = inlined_call_operand.vmem [shape: f32[8,128], index: 2, kind: input, shape index: {}]   ;;  %s1144_s3 = inlined_call_operand.vmem [shape: f32[16,8], index: 3, kind: output, shape index: {}]  }
   0x1   :  { %751 = vmatprep.subr.bf16.mxu0 %v911_v0  ;;  %v854_v1 = vld [vmem:[%s1141_s1] sm:$0xff]   ;;  %767 = vmatprep.mubr.msk.bf16.mxu0 %vm912_vm0, %v911_v0  ;;  %v855_v2 = vld [vmem:[%s1141_s1 + $0x8] sm:$0xff]   ;;  %v856_v3 = vld [vmem:[%s1141_s1 + $0x10] sm:$0xff]  }
   0x2   :  { %771 = vmatprep.subr.bf16.mxu1 %v911_v0  ;;  %787 = vmatprep.mubr.msk.bf16.mxu1 %vm912_vm0, %v911_v0  ;;  %v857_v4 = vld [vmem:[%s1141_s1 + $0x18] sm:$0xff]   ;;  %v858_v5 = vld [vmem:[%s1141_s1 + $0x20] sm:$0xff]   ;;  %v859_v6 = vld [vmem:[%s1141_s1 + $0x28] sm:$0xff]   ;;  %v1036_v38 = vand.u32 127, %v133_v37 }
   0x3   :  { %752 = vmatpush3.bf16.msra.mxu0 %v854_v1  ;;  %v860_v7 = vld [vmem:[%s1141_s1 + $0x30] sm:$0xff]   ;;  %v861_v8 = vld [vmem:[%s1141_s1 + $0x38] sm:$0xff]   ;;  %v862_v9 = vld [vmem:[%s1142_s0] sm:$0xff]  }
   0x4   :  { %753 = vmatprep.subr.bf16.mxu0 %v911_v0  ;;  %v863_v10 = vld [vmem:[%s1141_s1 + $0x40] sm:$0xff]   ;;  %v864_v11 = vld [vmem:[%s1141_s1 + $0x48] sm:$0xff]   ;;  %v865_v12 = vld [vmem:[%s1141_s1 + $0x50] sm:$0xff]   ;;  %vm135_vm1 = vcmp.lt.s32.totalorder %v1036_v38, 64  ;;  %vm643_vm2 = vcmp.lt.s32.totalorder %v1036_v38, 2 }
   0x5   :  { %772 = vmatpush3.bf16.msra.mxu1 %v863_v10  ;;  %v866_v13 = vld [vmem:[%s1141_s1 + $0x58] sm:$0xff]   ;;  %v867_v14 = vld [vmem:[%s1141_s1 + $0x60] sm:$0xff]   ;;  %v868_v15 = vld [vmem:[%s1141_s1 + $0x68] sm:$0xff]  }
   0x6   :  { %773 = vmatprep.subr.bf16.mxu1 %v911_v0  ;;  %v869_v16 = vld [vmem:[%s1141_s1 + $0x70] sm:$0xff]   ;;  %v870_v17 = vld [vmem:[%s1141_s1 + $0x78] sm:$0xff]   ;;  %v871_v18 = vld [vmem:[%s1141_s1 + $0x80] sm:$0xff]  }
   0x7   :  { %754 = vmatpush3.bf16.msra.mxu0 %v855_v2  ;;  %v872_v19 = vld [vmem:[%s1141_s1 + $0x88] sm:$0xff]   ;;  %v873_v20 = vld [vmem:[%s1141_s1 + $0x90] sm:$0xff]   ;;  %v874_v21 = vld [vmem:[%s1141_s1 + $0x98] sm:$0xff]  }
   0x8   :  { %755 = vmatprep.subr.bf16.mxu0 %v911_v0  ;;  %v875_v22 = vld [vmem:[%s1141_s1 + $0xa0] sm:$0xff]   ;;  %v876_v23 = vld [vmem:[%s1141_s1 + $0xa8] sm:$0xff]   ;;  %v877_v46 = vld [vmem:[%s1141_s1 + $0xb0] sm:$0xff]  }
   0x9   :  { %774 = vmatpush3.bf16.msra.mxu1 %v864_v11  ;;  %v653_v24 = vld [vmem:[%s1143_s2] ss:$0 sm:$0xff]  ;;  %v878_v47 = vld [vmem:[%s1141_s1 + $0xb8] sm:$0xff]   ;;  %v880_v49 = vld [vmem:[%s1141_s1 + $0xc8] sm:$0xff]  }
   0xa   :  { %775 = vmatprep.subr.bf16.mxu1 %v911_v0  ;;  %v879_v48 = vld [vmem:[%s1141_s1 + $0xc0] sm:$0xff]   ;;  %v881_v50 = vld [vmem:[%s1141_s1 + $0xd0] sm:$0xff]   ;;  %v882_v51 = vld [vmem:[%s1141_s1 + $0xd8] sm:$0xff]  }
   0xb   :  { %756 = vmatpush3.bf16.msra.mxu0 %v856_v3  ;;  %v883_v52 = vld [vmem:[%s1141_s1 + $0xe0] sm:$0xff]   ;;  %v884_v53 = vld [vmem:[%s1141_s1 + $0xe8] sm:$0xff]   ;;  %v885_v1 = vld [vmem:[%s1141_s1 + $0xf0] sm:$0xff]  }
   0xc   :  { %757 = vmatprep.subr.bf16.mxu0 %v911_v0  ;;  %v665_v54 = vld [vmem:[%s1143_s2 + $0x1] ss:$0 sm:$0xff]  ;;  %v886_v2 = vld [vmem:[%s1141_s1 + $0xf8] sm:$0xff]  }
   0xd   :  { %776 = vmatpush3.bf16.msra.mxu1 %v865_v12  ;;  %v887_v3 = vld [vmem:[%s1141_s1 + $0x100] sm:$0xff]  }
   0xe   :  { %777 = vmatprep.subr.bf16.mxu1 %v911_v0 }
   0xf   :  { %758 = vmatpush3.bf16.msra.mxu0 %v857_v4  ;;  %v888_v4 = vld [vmem:[%s1141_s1 + $0x108] sm:$0xff]  }
  0x10   :  { %759 = vmatprep.subr.bf16.mxu0 %v911_v0 }
  0x11   :  { %778 = vmatpush3.bf16.msra.mxu1 %v866_v13 }
  0x12   :  { %779 = vmatprep.subr.bf16.mxu1 %v911_v0 }
  0x13   :  { %760 = vmatpush3.bf16.msra.mxu0 %v858_v5  ;;  %v889_v5 = vld [vmem:[%s1141_s1 + $0x110] sm:$0xff]  }
  0x14   :  { %761 = vmatprep.subr.bf16.mxu0 %v911_v0 }
  0x15   :  { %780 = vmatpush3.bf16.msra.mxu1 %v867_v14 }
  0x16   :  { %781 = vmatprep.subr.bf16.mxu1 %v911_v0 }
  0x17   :  { %762 = vmatpush3.bf16.msra.mxu0 %v859_v6  ;;  %v890_v6 = vld [vmem:[%s1141_s1 + $0x118] sm:$0xff]  }
  0x18   :  { %763 = vmatprep.subr.bf16.mxu0 %v911_v0 }
  0x19   :  { %782 = vmatpush3.bf16.msra.mxu1 %v868_v15 }
  0x1a   :  { %783 = vmatprep.subr.bf16.mxu1 %v911_v0 }
  0x1b   :  { %764 = vmatpush3.bf16.msra.mxu0 %v860_v7  ;;  %v891_v7 = vld [vmem:[%s1141_s1 + $0x120] sm:$0xff]  }
  0x1c   :  { %765 = vmatprep.subr.bf16.mxu0 %v911_v0 }
  0x1d   :  { %784 = vmatpush3.bf16.msra.mxu1 %v869_v16 }
  0x1e   :  { %785 = vmatprep.subr.bf16.mxu1 %v911_v0 }
  0x1f   :  { %766 = vmatpush3.bf16.msra.mxu0 %v861_v8  ;;  %v892_v8 = vld [vmem:[%s1141_s1 + $0x128] sm:$0xff]  }
  0x20   :  { %791 = vmatprep.subr.bf16.mxu0 %v911_v0 }
  0x21   :  { %786 = vmatpush3.bf16.msra.mxu1 %v870_v17 }
  0x22   :  { %768 = vmatmul.mubr.bf16.vlgmr.msra.gmra.mrb[0].mxu0 %v862_v9  ;;  %811 = vmatprep.subr.bf16.mxu1 %v911_v0  ;;  %v674_v9 = vld [vmem:[%s1143_s2 + $0x2] ss:$0 sm:$0xff] }
  0x23   :  { %807 = vmatprep.mubr.msk.bf16.mxu0 %vm912_vm0, %v911_v0  ;;  %792 = vmatpush3.bf16.msra.mxu0 %v871_v18 }
  0x24   :  { %793 = vmatprep.subr.bf16.mxu0 %v911_v0 }
  0x27   :  { %794 = vmatpush3.bf16.msra.mxu0 %v872_v19  ;;  %v893_v19 = vld [vmem:[%s1141_s1 + $0x130] sm:$0xff]  }
  0x28   :  { %795 = vmatprep.subr.bf16.mxu0 %v911_v0 }
  0x2b   :  { %796 = vmatpush3.bf16.msra.mxu0 %v873_v20  ;;  %v894_v20 = vld [vmem:[%s1141_s1 + $0x138] sm:$0xff]   ;;  %s913_s1 = smov 126  }
  0x2c   :  { %797 = vmatprep.subr.bf16.mxu0 %v911_v0 }
  0x2f   :  { %798 = vmatpush3.bf16.msra.mxu0 %v874_v21  ;;  %v683_v21 = vld [vmem:[%s1143_s2 + $0x3] ss:$0 sm:$0xff] }
  0x30   :  { %799 = vmatprep.subr.bf16.mxu0 %v911_v0 }
  0x33   :  { %800 = vmatpush3.bf16.msra.mxu0 %v875_v22 }
  0x34   :  { %801 = vmatprep.subr.bf16.mxu0 %v911_v0 }
  0x37   :  { %802 = vmatpush3.bf16.msra.mxu0 %v876_v23 }
  0x38   :  { %803 = vmatprep.subr.bf16.mxu0 %v911_v0 }
  0x3b   :  { %804 = vmatpush3.bf16.msra.mxu0 %v877_v46 }
  0x3c   :  { %805 = vmatprep.subr.bf16.mxu0 %v911_v0 }
  0x3f   :  { %806 = vmatpush3.bf16.msra.mxu0 %v878_v47 }
  0x40   :  { %831 = vmatprep.subr.bf16.mxu0 %v911_v0 }
  0xf5   :  { %v126_v25 = vpop.f32.mrb[0].mxu0 }
  0xf6   :  { %v127_v26 = vadd.f32 %v653_v24, %v126_v25  ;;  %v769_v27 = vpop.f32.mrb[1].mxu0 }
  0xf7   :  { %v129_v28 = vpop.f32.mrb[2].mxu0 }
  0xf8   :  { %v663_v29 = vmul.f32 -1.442695, %v127_v26  ;;  %v130_v30 = vadd.f32 %v653_v24, %v129_v28  ;;  %v770_v31 = vpop.f32.mrb[3].mxu0  ;;  %v136_v40 = vmax.f32 %v127_v26, 0.0 }
  0xfa   :  { %895 = vpow2.f32 %v663_v29  ;;  %v664_v32 = vmul.f32 -1.442695, %v130_v30  ;;  %v137_v41 = vmax.f32 %v130_v30, 0.0 }
  0xfc   :  { %897 = vpow2.f32 %v664_v32 }
 0x104   :  { %v896_v33 = vpop.eup %895 }
 0x105   :  { %v144_v34 = vadd.f32 1.0, %v896_v33 }
 0x106   :  { %v898_v35 = vpop.eup %897 }
 0x107   :  { %899 = vrcp.f32 %v144_v34  ;;  %v145_v36 = vadd.f32 1.0, %v898_v35 }
 0x109   :  { %901 = vrcp.f32 %v145_v36 }
 0x111   :  { %v900_v39 = vpop.eup %899 }
 0x112   :  { %v150_v43 = vsel %vm135_vm1, %v136_v40, %v900_v39  ;;  %v701_v40 = vld [vmem:[%s1143_s2 + $0x5] ss:$0 sm:$0xff] }
 0x113   :  { %v902_v42 = vpop.eup %901 }
 0x114   :  { %v151_v44 = vsel %vm135_vm1, %v137_v41, %v902_v42  ;;  %v702_v41 = vld [vmem:[%s1143_s2 + $0x6] ss:$0 sm:$0xff] }
 0x115   :  { %v152_v45 = vpack.c.bf16 %v151_v44, %v150_v43 }
 0x117   :  { %788 = vmatmul.mubr.bf16.vlgmr.msra.gmra.mrb[0].mxu1 %v152_v45  ;;  %v703_v45 = vld [vmem:[%s1143_s2 + $0x7] ss:$0 sm:$0xff] }
 0x118   :  { %827 = vmatprep.mubr.msk.bf16.mxu1 %vm912_vm0, %v911_v0  ;;  %812 = vmatpush3.bf16.msra.mxu1 %v879_v48 }
 0x119   :  { %813 = vmatprep.subr.bf16.mxu1 %v911_v0 }
 0x11c   :  { %814 = vmatpush3.bf16.msra.mxu1 %v880_v49 }
 0x11d   :  { %815 = vmatprep.subr.bf16.mxu1 %v911_v0 }
 0x120   :  { %816 = vmatpush3.bf16.msra.mxu1 %v881_v50 }
 0x121   :  { %817 = vmatprep.subr.bf16.mxu1 %v911_v0 }
 0x124   :  { %818 = vmatpush3.bf16.msra.mxu1 %v882_v51 }
 0x125   :  { %819 = vmatprep.subr.bf16.mxu1 %v911_v0 }
 0x128   :  { %820 = vmatpush3.bf16.msra.mxu1 %v883_v52 }
 0x129   :  { %821 = vmatprep.subr.bf16.mxu1 %v911_v0 }
 0x12c   :  { %822 = vmatpush3.bf16.msra.mxu1 %v884_v53 }
 0x12d   :  { %823 = vmatprep.subr.bf16.mxu1 %v911_v0 }
 0x130   :  { %824 = vmatpush3.bf16.msra.mxu1 %v885_v1 }
 0x131   :  { %825 = vmatprep.subr.bf16.mxu1 %v911_v0 }
 0x134   :  { %826 = vmatpush3.bf16.msra.mxu1 %v886_v2 }
 0x1ea   :  { %v256_v55 = vpop.f32.mrb[0].mxu1 }
 0x1eb   :  { %v257_v56 = vadd.f32 %v665_v54, %v256_v55  ;;  %v789_v57 = vpop.f32.mrb[1].mxu1 }
 0x1ec   :  { %v259_v58 = vpop.f32.mrb[2].mxu1 }
 0x1ed   :  { %v260_v59 = vadd.f32 %v665_v54, %v259_v58  ;;  %v790_v60 = vpop.f32.mrb[3].mxu1  ;;  %v263_v61 = vmax.f32 %v257_v56, 0.0 }
 0x1ef   :  { %v264_v62 = vmax.f32 %v260_v59, 0.0 }
 0x1f1   :  { %v265_v63 = vpack.c.bf16 %v264_v62, %v263_v61 }
 0x1f3   :  { %808 = vmatmul.mubr.bf16.vlgmr.msra.gmra.mrb[4].mxu0 %v265_v63 }
 0x1f4   :  { %847 = vmatprep.mubr.msk.bf16.mxu0 %vm912_vm0, %v911_v0  ;;  %832 = vmatpush3.bf16.msra.mxu0 %v887_v3 }
 0x1f5   :  { %833 = vmatprep.subr.bf16.mxu0 %v911_v0 }
 0x1f8   :  { %834 = vmatpush3.bf16.msra.mxu0 %v888_v4 }
 0x1f9   :  { %835 = vmatprep.subr.bf16.mxu0 %v911_v0 }
 0x1fc   :  { %836 = vmatpush3.bf16.msra.mxu0 %v889_v5 }
 0x1fd   :  { %837 = vmatprep.subr.bf16.mxu0 %v911_v0 }
 0x200   :  { %838 = vmatpush3.bf16.msra.mxu0 %v890_v6 }
 0x201   :  { %839 = vmatprep.subr.bf16.mxu0 %v911_v0 }
 0x204   :  { %840 = vmatpush3.bf16.msra.mxu0 %v891_v7 }
 0x205   :  { %841 = vmatprep.subr.bf16.mxu0 %v911_v0 }
 0x208   :  { %842 = vmatpush3.bf16.msra.mxu0 %v892_v8 }
 0x209   :  { %843 = vmatprep.subr.bf16.mxu0 %v911_v0 }
 0x20c   :  { %844 = vmatpush3.bf16.msra.mxu0 %v893_v19 }
 0x20d   :  { %845 = vmatprep.subr.bf16.mxu0 %v911_v0  ;;  %v692_v0 = vld [vmem:[%s1143_s2 + $0x4] ss:$0 sm:$0xff] }
 0x210   :  { %846 = vmatpush3.bf16.msra.mxu0 %v894_v20 }
 0x2c6   :  { %v369_v10 = vpop.f32.mrb[4].mxu0 }
 0x2c7   :  { %v370_v11 = vadd.f32 %v674_v9, %v369_v10  ;;  %v809_v12 = vpop.f32.mrb[5].mxu0 }
 0x2c8   :  { %v372_v13 = vpop.f32.mrb[6].mxu0 }
 0x2c9   :  { %v373_v14 = vadd.f32 %v674_v9, %v372_v13  ;;  %v810_v15 = vpop.f32.mrb[7].mxu0  ;;  %v376_v16 = vmax.f32 %v370_v11, 0.0 }
 0x2cb   :  { %v377_v17 = vmax.f32 %v373_v14, 0.0 }
 0x2cd   :  { %v378_v18 = vpack.c.bf16 %v377_v17, %v376_v16 }
 0x2cf   :  { %828 = vmatmul.mubr.bf16.vlgmr.msra.gmra.mrb[4].mxu1 %v378_v18 }
 0x3a2   :  { %v482_v22 = vpop.f32.mrb[4].mxu1 }
 0x3a3   :  { %v483_v23 = vadd.f32 %v683_v21, %v482_v22  ;;  %v829_v24 = vpop.f32.mrb[5].mxu1 }
 0x3a4   :  { %v485_v25 = vpop.f32.mrb[6].mxu1 }
 0x3a5   :  { %v486_v26 = vadd.f32 %v683_v21, %v485_v25  ;;  %v830_v27 = vpop.f32.mrb[7].mxu1  ;;  %v489_v28 = vmax.f32 %v483_v23, 0.0 }
 0x3a7   :  { %v490_v29 = vmax.f32 %v486_v26, 0.0 }
 0x3a9   :  { %v491_v30 = vpack.c.bf16 %v490_v29, %v489_v28 }
 0x3ab   :  { %848 = vmatmul.mubr.bf16.vlgmr.msra.gmra.mrb[8].mxu0 %v491_v30 }
 0x47e   :  { %v595_v31 = vpop.f32.mrb[8].mxu0 }
 0x47f   :  { %v596_v32 = vadd.f32 %v692_v0, %v595_v31  ;;  %v849_v33 = vpop.f32.mrb[9].mxu0 }
 0x480   :  { %v598_v34 = vpop.f32.mrb[10].mxu0 }
 0x481   :  { %v602_v35 = vmax.f32 %v596_v32, 0.0  ;;  %v599_v36 = vadd.f32 %v692_v0, %v598_v34  ;;  %v850_v37 = vpop.f32.mrb[11].mxu0 }
 0x483   :  { %604 = vrot.lane.b32.xlu0 %v602_v35, %s913_s1  ;;  %v603_v39 = vmax.f32 %v599_v36, 0.0  ;;  %v613_v43 = vmul.f32 %v701_v40, %v602_v35 }
 0x485   :  { %v614_v48 = vmul.f32 %v701_v40, %v603_v39 }
 0x487   :  { %606 = vrot.lane.b32.xlu0 %v603_v39, %s913_s1 }
 0x4f5   :  { %v605_v42 = vpop.permute.xlu0 %604 }
 0x4f6   :  { %v620_v44 = vmul.f32 %v702_v41, %v605_v42 }
 0x4f8   :  { %v622_v46 = vadd.f32 %v620_v44, %v613_v43 }
 0x4f9   :  { %v607_v47 = vpop.permute.xlu0 %606 }
 0x4fa   :  { %v629_v49 = vadd.f32 %v703_v45, %v622_v46  ;;  %v621_v50 = vmul.f32 %v702_v41, %v607_v47 }
 0x4fc   :  { %v704_v51 = vmul.f32 -1.442695, %v629_v49  ;;  %v623_v52 = vadd.f32 %v621_v50, %v614_v48 }
 0x4fe   :  { %903 = vpow2.f32 %v704_v51  ;;  %v630_v53 = vadd.f32 %v703_v45, %v623_v52 }
 0x500   :  { %v705_v54 = vmul.f32 -1.442695, %v630_v53 }
 0x502   :  { %905 = vpow2.f32 %v705_v54 }
 0x508   :  { %v904_v55 = vpop.eup %903 }
 0x509   :  { %v637_v56 = vadd.f32 1.0, %v904_v55 }
 0x50b   :  { %907 = vrcp.f32 %v637_v56 }
 0x50c   :  { %v906_v57 = vpop.eup %905 }
 0x50d   :  { %v638_v58 = vadd.f32 1.0, %v906_v57 }
 0x50f   :  { %909 = vrcp.f32 %v638_v58 }
 0x515   :  { %v908_v59 = vpop.eup %907 }
 0x516   :  { %v644_v60 = vsel %vm643_vm2, %v908_v59, 0.0 }
 0x517   :  { %647 = vst.msk [vmem:[%s1144_s3] sm:$0xff] %vm646_vm3, %v644_v60 }
 0x519   :  { %v910_v61 = vpop.eup %909 }
 0x51a   :  { %v645_v62 = vsel %vm643_vm2, %v910_v61, 0.0 }
 0x51b   :  { %648 = vst.msk [vmem:[%s1144_s3 + $0x8] sm:$0xff] %vm646_vm3, %v645_v62 }

</bundles_post_ra>
